<compile_context>
chip_gen: v5e
topology: v5e:2x2
jax: 0.10.0
libtpu: 0.0.40
codegen_flags: <defaults>
</compile_context>

<pallas_src>
import jax
import jax.numpy as jnp
from jax.experimental import pallas as pl
from jax.experimental.pallas import tpu as pltpu


def _self_attention_kernel(x_ref, w1_ref, b1_ref, w2_ref, o_ref):
    # x_ref:  (BB, S, H)  block of batch elements
    # w1_ref: (H, D), b1_ref: (1, D), w2_ref: (1, D)   (w2 passed as a row; b2 dropped)
    # o_ref:  (BB, H)
    bb, s, hd = x_ref.shape
    d = w1_ref.shape[1]

    x = x_ref[...]                                       # (BB, S, H) f32

    # --- Linear(H, 64) + bias + ReLU on the MXU, one matmul for all BB*S rows ---
    xf = x.reshape(bb * s, hd)                           # (BB*S, H)
    h = jnp.dot(xf, w1_ref[...], preferred_element_type=jnp.float32) + b1_ref[...]
    h = jnp.maximum(h, 0.0)                              # (BB*S, D)

    # --- Linear(64, 1) on the VPU: multiply by w2 row + lane reduction.
    #     (Avoids an N=1 MXU matmul; b2 omitted: softmax(e + c) == softmax(e).)
    h3 = h.reshape(bb, s, d)                             # (BB, S, D)
    e = jnp.sum(h3 * w2_ref[...].reshape(1, 1, d), axis=-1, keepdims=True)  # (BB, S, 1)

    # --- softmax over the sequence axis ---
    m = jnp.max(e, axis=1, keepdims=True)                # (BB, 1, 1)
    p = jnp.exp(e - m)                                   # (BB, S, 1)
    inv = pl.reciprocal(jnp.sum(p, axis=1, keepdims=True), approx=True)
    w = p * inv                                          # (BB, S, 1)

    # --- weighted sum over S (VPU multiply + sublane reduce; no M=1 matmul) ---
    o_ref[...] = jnp.sum(x * w, axis=1)                  # (BB, H)


def self_attention(x, w1, b1, w2, b2=None, *, block_b=16):
    """x: [B, S, H] f32, w1: [H, 64], b1: [64], w2: [64, 1], b2: [1] -> [B, H] f32.

    b2 is accepted for interface fidelity but unused: softmax is shift-invariant.
    """
    del b2
    B, S, H = x.shape
    D = w1.shape[1]

    BB = max(8, block_b)
    B_pad = ((B + BB - 1) // BB) * BB
    x_p = x if B_pad == B else jnp.pad(x, ((0, B_pad - B), (0, 0), (0, 0)))

    b1_row = b1.reshape(1, D)
    w2_row = w2.reshape(1, D)

    out = pl.pallas_call(
        _self_attention_kernel,
        out_shape=jax.ShapeDtypeStruct((B_pad, H), jnp.float32),
        grid_spec=pltpu.PrefetchScalarGridSpec(
            num_scalar_prefetch=0,
            grid=(B_pad // BB,),
            in_specs=[
                pl.BlockSpec((BB, S, H), lambda b: (b, 0, 0)),
                pl.BlockSpec((H, D), lambda b: (0, 0)),
                pl.BlockSpec((1, D), lambda b: (0, 0)),
                pl.BlockSpec((1, D), lambda b: (0, 0)),
            ],
            out_specs=pl.BlockSpec((BB, H), lambda b: (b, 0)),
        ),
        compiler_params=pltpu.CompilerParams(
            dimension_semantics=("parallel",),
        ),
    )(x_p, w1, b1_row, w2_row)

    return out[:B]


def self_attention_ref(x, w1, b1, w2, b2):
    # plain-JAX reference matching the PyTorch forward (b2 included here)
    h = jnp.maximum(jnp.einsum("bsh,hd->bsd", x, w1) + b1, 0.0)
    e = jnp.einsum("bsd,do->bso", h, w2) + b2          # (B, S, 1)
    wts = jax.nn.softmax(e[..., 0], axis=1)            # (B, S)
    return jnp.sum(x * wts[..., None], axis=1)         # (B, H)


if __name__ == "__main__":
    B, S, H, D = 2, 8, 32, 64

    key = jax.random.PRNGKey(0)
    kx, kw1, kb1, kw2, kb2 = jax.random.split(key, 5)

    x = jax.random.normal(kx, (B, S, H), dtype=jnp.float32)
    w1 = jax.random.normal(kw1, (H, D), dtype=jnp.float32) * 0.1
    b1 = jax.random.normal(kb1, (D,), dtype=jnp.float32) * 0.1
    w2 = jax.random.normal(kw2, (D, 1), dtype=jnp.float32) * 0.1
    b2 = jax.random.normal(kb2, (1,), dtype=jnp.float32) * 0.1

    out = self_attention(x, w1, b1, w2, b2)
    out = jax.block_until_ready(out)

    ref = self_attention_ref(x, w1, b1, w2, b2)
    assert out.shape == (B, H)
    assert jnp.allclose(out, ref, atol=1e-3, rtol=1e-3), "mismatch vs reference"

    print("KERNEL_OK")
</pallas_src>

<mosaic_0001>
module attributes {stable_mosaic.version = 11 : i64} {
  func.func @_self_attention_kernel(%arg0: i32, %arg1: memref<16x8x32xf32, #tpu.memory_space<vmem>>, %arg2: memref<32x64xf32, #tpu.memory_space<vmem>>, %arg3: memref<1x64xf32, #tpu.memory_space<vmem>>, %arg4: memref<1x64xf32, #tpu.memory_space<vmem>>, %arg5: memref<16x32xf32, #tpu.memory_space<vmem>>) attributes {dimension_semantics = [#tpu.dimension_semantics<parallel>], iteration_bounds = array<i64: 1>, scalar_prefetch = 0 : i64, scratch_operands = 0 : i64, tpu.core_type = #tpu.core_type<tc>, window_params = [{transform_indices = @transform_0, window_bounds = array<i64: 16, 8, 32>}, {pipeline_mode = #tpu.pipeline_mode<synchronous>, transform_indices = @transform_1, window_bounds = array<i64: 32, 64>}, {pipeline_mode = #tpu.pipeline_mode<synchronous>, transform_indices = @transform_2, window_bounds = array<i64: 1, 64>}, {pipeline_mode = #tpu.pipeline_mode<synchronous>, transform_indices = @transform_3, window_bounds = array<i64: 1, 64>}, {transform_indices = @transform_4, window_bounds = array<i64: 16, 32>}]} {
    %c0 = arith.constant 0 : index
    %c0_0 = arith.constant 0 : index
    %c0_1 = arith.constant 0 : index
    %0 = vector.load %arg1[%c0, %c0_0, %c0_1] : memref<16x8x32xf32, #tpu.memory_space<vmem>>, vector<16x8x32xf32>
    %1 = vector.shape_cast %0 : vector<16x8x32xf32> to vector<128x32xf32>
    %c0_2 = arith.constant 0 : index
    %c0_3 = arith.constant 0 : index
    %2 = vector.load %arg2[%c0_2, %c0_3] : memref<32x64xf32, #tpu.memory_space<vmem>>, vector<32x64xf32>
    %cst = arith.constant dense<0.000000e+00> : vector<128x64xf32>
    %3 = tpu.matmul %1, %2, %cst {dimension_numbers = #tpu.dot_dimension_numbers<[1], [0], [0], [1], [0, 0, 1, 1], [], []>} : vector<128x32xf32>, vector<32x64xf32>, vector<128x64xf32> -> vector<128x64xf32>
    %c0_4 = arith.constant 0 : index
    %c0_5 = arith.constant 0 : index
    %4 = vector.load %arg3[%c0_4, %c0_5] : memref<1x64xf32, #tpu.memory_space<vmem>>, vector<1x64xf32>
    %5 = vector.broadcast %4 : vector<1x64xf32> to vector<128x64xf32>
    %6 = arith.addf %3, %5 : vector<128x64xf32>
    %cst_6 = arith.constant 0.000000e+00 : f32
    %7 = vector.broadcast %cst_6 : f32 to vector<128x64xf32>
    %8 = arith.maximumf %6, %7 : vector<128x64xf32>
    %9 = vector.shape_cast %8 : vector<128x64xf32> to vector<16x8x64xf32>
    %c0_7 = arith.constant 0 : index
    %c0_8 = arith.constant 0 : index
    %10 = vector.load %arg4[%c0_7, %c0_8] : memref<1x64xf32, #tpu.memory_space<vmem>>, vector<1x64xf32>
    %11 = vector.shape_cast %10 : vector<1x64xf32> to vector<1x1x64xf32>
    %12 = vector.broadcast %11 : vector<1x1x64xf32> to vector<16x8x64xf32>
    %13 = arith.mulf %9, %12 : vector<16x8x64xf32>
    %cst_9 = arith.constant dense<0.000000e+00> : vector<16x8xf32>
    %14 = vector.multi_reduction <add>, %13, %cst_9 [2] : vector<16x8x64xf32> to vector<16x8xf32>
    %15 = vector.shape_cast %14 : vector<16x8xf32> to vector<16x8x1xf32>
    %cst_10 = arith.constant dense<0xFF800000> : vector<16x1xf32>
    %16 = vector.multi_reduction <maximumf>, %15, %cst_10 [1] : vector<16x8x1xf32> to vector<16x1xf32>
    %17 = vector.shape_cast %16 : vector<16x1xf32> to vector<16x1x1xf32>
    %18 = vector.broadcast %17 : vector<16x1x1xf32> to vector<16x8x1xf32>
    %19 = arith.subf %15, %18 : vector<16x8x1xf32>
    %20 = math.exp %19 : vector<16x8x1xf32>
    %cst_11 = arith.constant dense<0.000000e+00> : vector<16x1xf32>
    %21 = vector.multi_reduction <add>, %20, %cst_11 [1] : vector<16x8x1xf32> to vector<16x1xf32>
    %22 = vector.shape_cast %21 : vector<16x1xf32> to vector<16x1x1xf32>
    %23 = tpu.reciprocal %22 {approx = true} : vector<16x1x1xf32> -> vector<16x1x1xf32>
    %24 = vector.broadcast %23 : vector<16x1x1xf32> to vector<16x8x1xf32>
    %25 = arith.mulf %20, %24 : vector<16x8x1xf32>
    %26 = vector.broadcast %25 : vector<16x8x1xf32> to vector<16x8x32xf32>
    %27 = arith.mulf %0, %26 : vector<16x8x32xf32>
    %cst_12 = arith.constant dense<0.000000e+00> : vector<16x32xf32>
    %28 = vector.multi_reduction <add>, %27, %cst_12 [1] : vector<16x8x32xf32> to vector<16x32xf32>
    %c0_13 = arith.constant 0 : index
    %c0_14 = arith.constant 0 : index
    %29 = vector.load %arg5[%c0_13, %c0_14] : memref<16x32xf32, #tpu.memory_space<vmem>>, vector<16x32xf32>
    tpu.vector_store %arg5[%c0_13, %c0_14], %28 {strides = array<i32>} : memref<16x32xf32, #tpu.memory_space<vmem>>, vector<16x32xf32>,
    return
  }
  func.func @transform_0(%arg0: i32) -> (i32, i32, i32) {
    %c0_i32 = arith.constant 0 : i32
    %c0_i32_0 = arith.constant 0 : i32
    %c0_i32_1 = arith.constant 0 : i32
    return %arg0, %c0_i32, %c0_i32_0 : i32, i32, i32
  }
  func.func @transform_1(%arg0: i32) -> (i32, i32) {
    %c0_i32 = arith.constant 0 : i32
    %c0_i32_0 = arith.constant 0 : i32
    %c0_i32_1 = arith.constant 0 : i32
    return %c0_i32, %c0_i32_0 : i32, i32
  }
  func.func @transform_2(%arg0: i32) -> (i32, i32) {
    %c0_i32 = arith.constant 0 : i32
    %c0_i32_0 = arith.constant 0 : i32
    %c0_i32_1 = arith.constant 0 : i32
    return %c0_i32, %c0_i32_0 : i32, i32
  }
  func.func @transform_3(%arg0: i32) -> (i32, i32) {
    %c0_i32 = arith.constant 0 : i32
    %c0_i32_0 = arith.constant 0 : i32
    %c0_i32_1 = arith.constant 0 : i32
    return %c0_i32, %c0_i32_0 : i32, i32
  }
  func.func @transform_4(%arg0: i32) -> (i32, i32) {
    %c0_i32 = arith.constant 0 : i32
    %c0_i32_0 = arith.constant 0 : i32
    return %arg0, %c0_i32 : i32, i32
  }
}

</mosaic_0001>

<bundles_post_ra>
// kernel: tpu_custom_call.1
= control target key start
LH: loop header
LB: loop body
LE: loop exit
PB: predicated region body
PF: predicated region fallthrough
CT: control target
= control target key end

     0   :  { %9 = vsyncpa [#allocation3], 0  ;;  %s1269_s0 = inlined_call_operand.hbm [shape: f32[16,8,32], index: 0, kind: input, shape index: {}]   ;;  %s1270_s1 = inlined_call_operand.hbm [shape: f32[32,64], index: 1, kind: input, shape index: {}]   ;;  %s1271_s2 = inlined_call_operand.vmem [shape: f32[1,64], index: 2, kind: input, shape index: {}]   ;;  %s1272_s3 = inlined_call_operand.vmem [shape: f32[1,64], index: 3, kind: input, shape index: {}]   ;;  %s1273_s4 = inlined_call_operand.hbm [shape: f32[16,32], index: 4, kind: output, shape index: {}]  }
   0x1   :  { %10 = vsyncpa [#allocation6], 0 }
   0x2   :  { %11 = vsyncpa [#allocation4], 0  ;;  %s16_s17 = sshll.u32 %s1269_s0, 4  ;;  %s914_s18 = smov [#allocation2]   ;;  %s17_s17 = int_to_ptr.hbm [resolvable:$true] %s16_s17 }
   0x3   :  { %s18_s19 = sshll.u32 %s914_s18, 4  ;;  %s29_s22 = sshll.u32 %s1270_s1, 4  ;;  %s19_s19 = int_to_ptr.vmem [resolvable:$true] %s18_s19  ;;  %s30_s22 = int_to_ptr.hbm [resolvable:$true] %s29_s22 }
   0x4   :  { %s915_s23 = smov 128   ;;  %s916_s24 = smov 8  }
   0x5   :  { %24 = dma.hbm_to_vmem [thread:$0]  %s17_s17, 2048, %s19_s19, [#allocation3], %s915_s23, %s915_s23, %s916_s24  }
   0x6   :  { %s917_s25 = smov [#allocation5]  }
   0x7   :  { %s31_s26 = sshll.u32 %s917_s25, 4  ;;  %s32_s26 = int_to_ptr.vmem [resolvable:$true] %s31_s26 }
   0x8   :  { %37 = dma.hbm_to_vmem [thread:$0]  %s30_s22, 512, %s32_s26, [#allocation6], %s915_s23, %s915_s23, %s916_s24  }
   0x9   :  { %908 = dma.done.wait [#allocation3], 2048  }
   0xa   :  { %909 = vsyncadd [#allocation3], 4294965248 }
   0xb   :  { %910 = dma.done.wait [#allocation6], 512  }
   0xc   :  { %911 = vsyncadd [#allocation6], 4294966784  ;;  %v69_v0 = vld [vmem:[#allocation5 + $0x18] sm:$0xff]  ;;  %v68_v1 = vld [vmem:[#allocation5 + $0x10] sm:$0xff]  ;;  %vm74_vm0 = vcmask 261120   ;;  %vm224_vm1 = vcmask 523264  }
   0xd   :  { %135 = vmatpush.msra.mxu0 %v69_v0  ;;  %750 = vmatpush.msra.mxu1 %v69_v0  ;;  %v67_v2 = vld [vmem:[#allocation5 + $0x8] sm:$0xff]  ;;  %v66_v3 = vld [vmem:[#allocation5] sm:$0xff]  ;;  %v988_v12 = vld [vmem:[#allocation2 + $0x10] sm:$0xff]  ;;  %vm689_vm2 = vcmask 1041409   ;;  %vm691_vm3 = vcmask 1042434   ;;  %vm693_vm4 = vcmask 1043459  }
   0xe   :  { %751 = vmatpush.msra.mxu2 %v69_v0  ;;  %752 = vmatpush.msra.mxu3 %v69_v0  ;;  %v956_v4 = vld [vmem:[#allocation2] sm:$0xff]  ;;  %v972_v8 = vld [vmem:[#allocation2 + $0x8] sm:$0xff]  ;;  %v990_v13 = vld [vmem:[#allocation2 + $0x30] sm:$0xff]  ;;  %vm695_vm5 = vcmask 1044484   ;;  %vm697_vm6 = vcmask 1045509   ;;  %vm699_vm7 = vcmask 1046534  }
   0xf   :  { %136 = vmatpush.msra.mxu0 %v68_v1  ;;  %753 = vmatpush.msra.mxu1 %v68_v1  ;;  %v958_v5 = vld [vmem:[#allocation2 + $0x20] sm:$0xff]  ;;  %v974_v9 = vld [vmem:[#allocation2 + $0x28] sm:$0xff]  ;;  %v992_v14 = vld [vmem:[#allocation2 + $0x50] sm:$0xff]  ;;  %vm701_vm8 = vcmask 1047559   ;;  %s720_s5 = sshll.u32 %s1273_s4, 4  ;;  %s721_s5 = int_to_ptr.hbm [resolvable:$true] %s720_s5 }
  0x10   :  { %754 = vmatpush.msra.mxu2 %v68_v1  ;;  %755 = vmatpush.msra.mxu3 %v68_v1  ;;  %v960_v6 = vld [vmem:[#allocation2 + $0x40] sm:$0xff]  ;;  %v976_v10 = vld [vmem:[#allocation2 + $0x48] sm:$0xff]  ;;  %v64_v15 = vld [vmem:[#allocation2 + $0x70] sm:$0xff] }
  0x11   :  { %137 = vmatpush.msra.mxu0 %v67_v2  ;;  %756 = vmatpush.msra.mxu1 %v67_v2  ;;  %v962_v7 = vld [vmem:[#allocation2 + $0x60] sm:$0xff]  ;;  %v978_v11 = vld [vmem:[#allocation2 + $0x68] sm:$0xff]  ;;  %v1001_v16 = vld [vmem:[#allocation2 + $0x18] sm:$0xff] }
  0x12   :  { %757 = vmatpush.msra.mxu2 %v67_v2  ;;  %758 = vmatpush.msra.mxu3 %v67_v2  ;;  %v57_v17 = vld [vmem:[#allocation2 + $0x38] sm:$0xff]  ;;  %v1014_v20 = vld [vmem:[%s1271_s2] ss:$0 sm:$0xff]  ;;  %s918_s2 = smov [#allocation7]  }
  0x13   :  { %138 = vmatpush.msra.mxu0 %v66_v3  ;;  %759 = vmatpush.msra.mxu1 %v66_v3  ;;  %v1003_v18 = vld [vmem:[#allocation2 + $0x58] sm:$0xff]  ;;  %v1021_v25 = vld [vmem:[%s1272_s3] ss:$0 sm:$0xff]  ;;  %s718_s3 = sshll.u32 %s918_s2, 4  ;;  %s719_s3 = int_to_ptr.vmem [resolvable:$true] %s718_s3 }
  0x14   :  { %760 = vmatpush.msra.mxu2 %v66_v3  ;;  %761 = vmatpush.msra.mxu3 %v66_v3  ;;  %v65_v19 = vld [vmem:[#allocation2 + $0x78] sm:$0xff] }
  0x15   :  { %734 = vmatmul.msk.f32.vlgmr.msra.gmra.mxu0 %vm74_vm0, %v956_v4  ;;  %738 = vmatmul.msk.f32.vlgmr.msra.gmra.mxu1 %vm74_vm0, %v958_v5 }
  0x16   :  { %742 = vmatmul.msk.f32.vlgmr.msra.gmra.mxu2 %vm74_vm0, %v960_v6  ;;  %746 = vmatmul.msk.f32.vlgmr.msra.gmra.mxu3 %vm74_vm0, %v962_v7 }
  0x1d   :  { %735 = vmatmul.msk.f32.gmra.mxu0 %vm74_vm0, %v972_v8  ;;  %739 = vmatmul.msk.f32.gmra.mxu1 %vm74_vm0, %v974_v9 }
  0x1e   :  { %743 = vmatmul.msk.f32.gmra.mxu2 %vm74_vm0, %v976_v10  ;;  %747 = vmatmul.msk.f32.gmra.mxu3 %vm74_vm0, %v978_v11 }
  0x25   :  { %736 = vmatmul.msk.f32.gmra.mxu0 %vm74_vm0, %v988_v12  ;;  %740 = vmatmul.msk.f32.gmra.mxu1 %vm74_vm0, %v990_v13 }
  0x26   :  { %744 = vmatmul.msk.f32.gmra.mxu2 %vm74_vm0, %v992_v14  ;;  %748 = vmatmul.msk.f32.gmra.mxu3 %vm74_vm0, %v64_v15 }
  0x2d   :  { %737 = vmatmul.msk.f32.gmra.mxu0 %vm74_vm0, %v1001_v16  ;;  %741 = vmatmul.msk.f32.gmra.mxu1 %vm74_vm0, %v57_v17 }
  0x2e   :  { %745 = vmatmul.msk.f32.gmra.mxu2 %vm74_vm0, %v1003_v18  ;;  %749 = vmatmul.msk.f32.gmra.mxu3 %vm74_vm0, %v65_v19 }
  0x92   :  { %v140_v21 = vpop.f32.mrf.mxu0  ;;  %v152_v22 = vpop.f32.mrf.mxu1 }
  0x93   :  { %v141_v23 = vadd.f32 %v1014_v20, %v140_v21  ;;  %v153_v24 = vadd.f32 %v1014_v20, %v152_v22 }
  0x95   :  { %v188_v26 = vmax.f32 %v141_v23, 0.0  ;;  %v192_v27 = vmax.f32 %v153_v24, 0.0 }
  0x97   :  { %v212_v28 = vmul.f32 %v1021_v25, %v192_v27  ;;  %v208_v29 = vmul.f32 %v1021_v25, %v188_v26 }
  0x99   :  { %v164_v30 = vpop.f32.mrf.mxu2  ;;  %v176_v31 = vpop.f32.mrf.mxu3  ;;  %v237_v32 = vsel %vm224_vm1, %v212_v28, 0.0  ;;  %v225_v33 = vsel %vm224_vm1, %v208_v29, 0.0 }
  0x9a   :  { %v165_v34 = vadd.f32 %v1014_v20, %v164_v30  ;;  %v177_v35 = vadd.f32 %v1014_v20, %v176_v31  ;;  %238 = vadd.xlane.f32.xlu2 %v237_v32  ;;  %226 = vadd.xlane.f32.xlu0 %v225_v33  ;;  %v143_v36 = vpop.f32.mrf.mxu0  ;;  %v155_v37 = vpop.f32.mrf.mxu1 }
  0x9b   :  { %v144_v38 = vadd.f32 %v1014_v20, %v143_v36  ;;  %v156_v39 = vadd.f32 %v1014_v20, %v155_v37 }
  0x9c   :  { %v196_v40 = vmax.f32 %v165_v34, 0.0  ;;  %v200_v41 = vmax.f32 %v177_v35, 0.0 }
  0x9d   :  { %v193_v43 = vmax.f32 %v156_v39, 0.0  ;;  %v189_v45 = vmax.f32 %v144_v38, 0.0 }
  0x9e   :  { %v216_v42 = vmul.f32 %v1021_v25, %v196_v40  ;;  %v220_v44 = vmul.f32 %v1021_v25, %v200_v41 }
  0x9f   :  { %v213_v51 = vmul.f32 %v1021_v25, %v193_v43  ;;  %v209_v56 = vmul.f32 %v1021_v25, %v189_v45 }
  0xa0   :  { %v249_v46 = vsel %vm224_vm1, %v216_v42, 0.0  ;;  %v261_v47 = vsel %vm224_vm1, %v220_v44, 0.0 }
  0xa1   :  { %v167_v48 = vpop.f32.mrf.mxu2  ;;  %v179_v49 = vpop.f32.mrf.mxu3  ;;  %250 = vadd.xlane.f32.xlu1 %v249_v46  ;;  %v240_v59 = vsel %vm224_vm1, %v213_v51, 0.0  ;;  %v228_v63 = vsel %vm224_vm1, %v209_v56, 0.0 }
  0xa2   :  { %v180_v50 = vadd.f32 %v1014_v20, %v179_v49  ;;  %262 = vadd.xlane.f32.xlu0 %v261_v47  ;;  %v146_v52 = vpop.f32.mrf.mxu0  ;;  %v158_v53 = vpop.f32.mrf.mxu1  ;;  %v168_v57 = vadd.f32 %v1014_v20, %v167_v48 }
  0xa3   :  { %v147_v54 = vadd.f32 %v1014_v20, %v146_v52  ;;  %v159_v55 = vadd.f32 %v1014_v20, %v158_v53 }
  0xa4   :  { %v201_v58 = vmax.f32 %v180_v50, 0.0  ;;  %v197_v0 = vmax.f32 %v168_v57, 0.0 }
  0xa5   :  { %v190_v61 = vmax.f32 %v147_v54, 0.0  ;;  %v194_v62 = vmax.f32 %v159_v55, 0.0 }
  0xa6   :  { %v221_v60 = vmul.f32 %v1021_v25, %v201_v58  ;;  %v217_v23 = vmul.f32 %v1021_v25, %v197_v0 }
  0xa7   :  { %v210_v15 = vmul.f32 %v1021_v25, %v190_v61  ;;  %v214_v21 = vmul.f32 %v1021_v25, %v194_v62 }
  0xa8   :  { %v264_v1 = vsel %vm224_vm1, %v221_v60, 0.0  ;;  %v252_v30 = vsel %vm224_vm1, %v217_v23, 0.0 }
  0xa9   :  { %v170_v2 = vpop.f32.mrf.mxu2  ;;  %241 = vadd.xlane.f32.xlu1 %v240_v59  ;;  %265 = vadd.xlane.f32.xlu2 %v264_v1  ;;  %v182_v3 = vpop.f32.mrf.mxu3  ;;  %v231_v24 = vsel %vm224_vm1, %v210_v15, 0.0  ;;  %v243_v27 = vsel %vm224_vm1, %v214_v21, 0.0 }
  0xaa   :  { %229 = vadd.xlane.f32.xlu0 %v228_v63  ;;  %v149_v17 = vpop.f32.mrf.mxu0  ;;  %v171_v22 = vadd.f32 %v1014_v20, %v170_v2  ;;  %v161_v28 = vpop.f32.mrf.mxu1  ;;  %v183_v38 = vadd.f32 %v1014_v20, %v182_v3 }
  0xab   :  { %v150_v19 = vadd.f32 %v1014_v20, %v149_v17  ;;  %v162_v34 = vadd.f32 %v1014_v20, %v161_v28 }
  0xac   :  { %v198_v29 = vmax.f32 %v171_v22, 0.0  ;;  %v202_v44 = vmax.f32 %v183_v38, 0.0 }
  0xad   :  { %v191_v26 = vmax.f32 %v150_v19, 0.0  ;;  %v195_v40 = vmax.f32 %v162_v34, 0.0 }
  0xae   :  { %v218_v39 = vmul.f32 %v1021_v25, %v198_v29  ;;  %v222_v48 = vmul.f32 %v1021_v25, %v202_v44 }
  0xaf   :  { %v211_v36 = vmul.f32 %v1021_v25, %v191_v26  ;;  %v215_v47 = vmul.f32 %v1021_v25, %v195_v40 }
  0xb0   :  { %v255_v46 = vsel %vm224_vm1, %v218_v39, 0.0  ;;  %v267_v51 = vsel %vm224_vm1, %v222_v48, 0.0 }
  0xb1   :  { %v173_v31 = vpop.f32.mrf.mxu2  ;;  %253 = vadd.xlane.f32.xlu1 %v252_v30  ;;  %232 = vadd.xlane.f32.xlu2 %v231_v24  ;;  %v185_v32 = vpop.f32.mrf.mxu3  ;;  %v234_v43 = vsel %vm224_vm1, %v211_v36, 0.0  ;;  %v246_v49 = vsel %vm224_vm1, %v215_v47, 0.0 }
  0xb2   :  { %v174_v33 = vadd.f32 %v1014_v20, %v173_v31  ;;  %244 = vadd.xlane.f32.xlu0 %v243_v27  ;;  %v186_v35 = vadd.f32 %v1014_v20, %v185_v32 }
  0xb4   :  { %v199_v37 = vmax.f32 %v174_v33, 0.0  ;;  %v203_v42 = vmax.f32 %v186_v35, 0.0 }
  0xb6   :  { %v219_v41 = vmul.f32 %v1021_v25, %v199_v37  ;;  %v223_v20 = vmul.f32 %v1021_v25, %v203_v42 }
  0xb8   :  { %v258_v45 = vsel %vm224_vm1, %v219_v41, 0.0  ;;  %v270_v50 = vsel %vm224_vm1, %v223_v20, 0.0 }
  0xb9   :  { %259 = vadd.xlane.f32.xlu1 %v258_v45  ;;  %256 = vadd.xlane.f32.xlu2 %v255_v46 }
  0xba   :  { %235 = vadd.xlane.f32.xlu0 %v234_v43 }
  0xc1   :  { %268 = vadd.xlane.f32.xlu1 %v267_v51  ;;  %247 = vadd.xlane.f32.xlu2 %v246_v49 }
  0xc2   :  { %271 = vadd.xlane.f32.xlu0 %v270_v50 }
 0x10d   :  { %v239_v52 = vpop.xlane.xlu2 %238  ;;  %v227_v53 = vpop.xlane.xlu0 %226 }
 0x10e   :  { %v297_v54 = vrot.slane %v239_v52, 4  ;;  %v273_v55 = vrot.slane %v227_v53, 4 }
 0x110   :  { %v298_v56 = vmax.f32 %v239_v52, %v297_v54  ;;  %v274_v57 = vmax.f32 %v227_v53, %v273_v55 }
 0x112   :  { %v299_v58 = vrot.slane %v298_v56, 2  ;;  %v275_v59 = vrot.slane %v274_v57, 2 }
 0x114   :  { %v300_v60 = vmax.f32 %v298_v56, %v299_v58  ;;  %v276_v61 = vmax.f32 %v274_v57, %v275_v59  ;;  %v251_v25 = vpop.xlane.xlu1 %250 }
 0x115   :  { %v321_v62 = vrot.slane %v251_v25, 4  ;;  %v263_v63 = vpop.xlane.xlu0 %262 }
 0x116   :  { %v301_v0 = vrot.slane %v300_v60, 1  ;;  %v277_v1 = vrot.slane %v276_v61, 1  ;;  %v345_v2 = vrot.slane %v263_v63, 4 }
 0x117   :  { %v322_v3 = vmax.f32 %v251_v25, %v321_v62 }
 0x118   :  { %v302_v15 = vmax.f32 %v300_v60, %v301_v0  ;;  %v278_v17 = vmax.f32 %v276_v61, %v277_v1  ;;  %v346_v19 = vmax.f32 %v263_v63, %v345_v2 }
 0x119   :  { %v323_v21 = vrot.slane %v322_v3, 2 }
 0x11a   :  { %v373_v22 = vsub.f32 %v239_v52, %v302_v15  ;;  %v369_v23 = vsub.f32 %v227_v53, %v278_v17  ;;  %v347_v24 = vrot.slane %v346_v19, 2 }
 0x11b   :  { %v324_v26 = vmax.f32 %v322_v3, %v323_v21 }
 0x11c   :  { %v393_v27 = vmul.f32 1.442695, %v373_v22  ;;  %v385_v28 = vmul.f32 1.442695, %v369_v23  ;;  %v348_v29 = vmax.f32 %v346_v19, %v347_v24  ;;  %v242_v30 = vpop.xlane.xlu1 %241  ;;  %v266_v31 = vpop.xlane.xlu2 %265 }
 0x11d   :  { %v325_v32 = vrot.slane %v324_v26, 1  ;;  %v303_v33 = vrot.slane %v242_v30, 4  ;;  %v351_v34 = vrot.slane %v266_v31, 4  ;;  %v230_v35 = vpop.xlane.xlu0 %229 }
 0x11e   :  { %769 = vpow2.f32 %v393_v27  ;;  %v349_v36 = vrot.slane %v348_v29, 1  ;;  %v279_v37 = vrot.slane %v230_v35, 4 }
 0x11f   :  { %771 = vpow2.f32 %v385_v28  ;;  %v326_v38 = vmax.f32 %v324_v26, %v325_v32  ;;  %v304_v39 = vmax.f32 %v242_v30, %v303_v33  ;;  %v352_v40 = vmax.f32 %v266_v31, %v351_v34 }
 0x120   :  { %v350_v41 = vmax.f32 %v348_v29, %v349_v36  ;;  %v280_v42 = vmax.f32 %v230_v35, %v279_v37 }
 0x121   :  { %v377_v43 = vsub.f32 %v251_v25, %v326_v38  ;;  %v305_v44 = vrot.slane %v304_v39, 2  ;;  %v353_v45 = vrot.slane %v352_v40, 2 }
 0x122   :  { %v381_v46 = vsub.f32 %v263_v63, %v350_v41  ;;  %v281_v47 = vrot.slane %v280_v42, 2 }
 0x123   :  { %v401_v20 = vmul.f32 1.442695, %v377_v43  ;;  %v306_v48 = vmax.f32 %v304_v39, %v305_v44  ;;  %v354_v49 = vmax.f32 %v352_v40, %v353_v45 }
 0x124   :  { %v1069_v50 = vpop.eup %769  ;;  %v409_v51 = vmul.f32 1.442695, %v381_v46  ;;  %v282_v52 = vmax.f32 %v280_v42, %v281_v47  ;;  %v1071_v53 = vpop.xlane.xlu1 %253 }
 0x125   :  { %v1073_v54 = vpop.xlane.xlu2 %232  ;;  %v1075_v55 = vpop.eup %771  ;;  %v441_v56 = vrot.slane %v1069_v50, 4  ;;  %773 = vpow2.f32 %v401_v20  ;;  %v307_v57 = vrot.slane %v306_v48, 1  ;;  %v355_v58 = vrot.slane %v354_v49, 1 }
 0x126   :  { %v1078_v59 = vpop.xlane.xlu0 %244  ;;  %v417_v60 = vrot.slane %v1075_v55, 4  ;;  %775 = vpow2.f32 %v409_v51  ;;  %v283_v61 = vrot.slane %v282_v52, 1  ;;  %v327_v25 = vrot.slane %v1071_v53, 4 }
 0x127   :  { %v442_v62 = vadd.f32 %v1069_v50, %v441_v56  ;;  %v308_v63 = vmax.f32 %v306_v48, %v307_v57  ;;  %v356_v0 = vmax.f32 %v354_v49, %v355_v58  ;;  %v285_v1 = vrot.slane %v1073_v54, 4 }
 0x128   :  { %v418_v2 = vadd.f32 %v1075_v55, %v417_v60  ;;  %v284_v3 = vmax.f32 %v282_v52, %v283_v61  ;;  %v328_v15 = vmax.f32 %v1071_v53, %v327_v25  ;;  %v309_v17 = vrot.slane %v1078_v59, 4 }
 0x129   :  { %v443_v19 = vrot.slane %v442_v62, 2  ;;  %v374_v21 = vsub.f32 %v242_v30, %v308_v63  ;;  %v382_v22 = vsub.f32 %v266_v31, %v356_v0  ;;  %v286_v23 = vmax.f32 %v1073_v54, %v285_v1 }
 0x12a   :  { %v419_v24 = vrot.slane %v418_v2, 2  ;;  %v370_v26 = vsub.f32 %v230_v35, %v284_v3  ;;  %v329_v27 = vrot.slane %v328_v15, 2  ;;  %v310_v34 = vmax.f32 %v1078_v59, %v309_v17 }
 0x12b   :  { %v1088_v28 = vpop.eup %773  ;;  %v395_v29 = vmul.f32 1.442695, %v374_v21  ;;  %v411_v32 = vmul.f32 1.442695, %v382_v22  ;;  %v287_v33 = vrot.slane %v286_v23, 2  ;;  %v444_v31 = vadd.f32 %v443_v19, %v442_v62 }
 0x12c   :  { %v1091_v36 = vpop.eup %775  ;;  %v420_v37 = vadd.f32 %v419_v24, %v418_v2  ;;  %v465_v38 = vrot.slane %v1088_v28, 4  ;;  %v387_v39 = vmul.f32 1.442695, %v370_v26  ;;  %v330_v30 = vmax.f32 %v328_v15, %v329_v27  ;;  %v1096_v44 = vpop.xlane.xlu1 %259 }
 0x12d   :  { %v489_v40 = vrot.slane %v1091_v36, 4  ;;  %777 = vpow2.f32 %v395_v29  ;;  %v288_v35 = vmax.f32 %v286_v23, %v287_v33  ;;  %v311_v49 = vrot.slane %v310_v34, 2  ;;  %v1115_v33 = vpop.xlane.xlu2 %256 }
 0x12e   :  { %v421_v41 = vrot.slane %v420_v37, 1  ;;  %v466_v42 = vadd.f32 %v1088_v28, %v465_v38  ;;  %779 = vpow2.f32 %v411_v32  ;;  %v331_v43 = vrot.slane %v330_v30, 1 }
 0x12f   :  { %v490_v45 = vadd.f32 %v1091_v36, %v489_v40  ;;  %781 = vpow2.f32 %v387_v39  ;;  %v289_v46 = vrot.slane %v288_v35, 1  ;;  %v445_v51 = vrot.slane %v444_v31, 1 }
 0x130   :  { %v422_v47 = vadd.f32 %v421_v41, %v420_v37  ;;  %v467_v20 = vrot.slane %v466_v42, 2  ;;  %v332_v48 = vmax.f32 %v330_v30, %v331_v43  ;;  %v339_v57 = vrot.slane %v1096_v44, 4 }
 0x131   :  { %v491_v52 = vrot.slane %v490_v45, 2  ;;  %v290_v56 = vmax.f32 %v288_v35, %v289_v46  ;;  %v312_v60 = vmax.f32 %v310_v34, %v311_v49  ;;  %v446_v17 = vadd.f32 %v445_v51, %v444_v31 }
 0x132   :  { %783 = vrcp.f32 %v422_v47  ;;  %v378_v58 = vsub.f32 %v1071_v53, %v332_v48  ;;  %v468_v25 = vadd.f32 %v467_v20, %v466_v42  ;;  %v340_v63 = vmax.f32 %v1096_v44, %v339_v57 }
 0x133   :  { %v1101_v61 = vpop.eup %777  ;;  %v371_v62 = vsub.f32 %v1073_v54, %v290_v56  ;;  %v313_v3 = vrot.slane %v312_v60, 1  ;;  %v492_v19 = vadd.f32 %v491_v52, %v490_v45  ;;  %v333_v35 = vrot.slane %v1115_v33, 4 }
 0x134   :  { %v1105_v0 = vpop.eup %779  ;;  %v447_v1 = vrot.slane %v1101_v61, 4  ;;  %v403_v2 = vmul.f32 1.442695, %v378_v58  ;;  %v341_v23 = vrot.slane %v340_v63, 2  ;;  %v469_v54 = vrot.slane %v468_v25, 1 }
 0x135   :  { %v1108_v15 = vpop.eup %781  ;;  %v495_v53 = vrot.slane %v1105_v0, 4  ;;  %v389_v21 = vmul.f32 1.442695, %v371_v62  ;;  %v314_v24 = vmax.f32 %v312_v60, %v313_v3  ;;  %v493_v34 = vrot.slane %v492_v19, 1 }
 0x136   :  { %v423_v22 = vrot.slane %v1108_v15, 4  ;;  %785 = vpow2.f32 %v403_v2  ;;  %v448_v27 = vadd.f32 %v1101_v61, %v447_v1  ;;  %v342_v39 = vmax.f32 %v340_v63, %v341_v23 }
 0x137   :  { %787 = vpow2.f32 %v389_v21  ;;  %v496_v29 = vadd.f32 %v1105_v0, %v495_v53  ;;  %v375_v37 = vsub.f32 %v1078_v59, %v314_v24  ;;  %v470_v31 = vadd.f32 %v469_v54, %v468_v25 }
 0x138   :  { %v784_v26 = vpop.eup %783  ;;  %v424_v32 = vadd.f32 %v1108_v15, %v423_v22  ;;  %789 = vrcp.f32 %v446_v17  ;;  %v449_v42 = vrot.slane %v448_v27, 2  ;;  %v343_v46 = vrot.slane %v342_v39, 1 }
 0x139   :  { %v529_v30 = vmul.f32 %v784_v26, %v1075_v55  ;;  %v397_v40 = vmul.f32 1.442695, %v375_v37  ;;  %v497_v43 = vrot.slane %v496_v29, 2  ;;  %v494_v20 = vadd.f32 %v493_v34, %v492_v19  ;;  %v1126_v55 = vpop.xlane.xlu0 %235 }
 0x13a   :  { %v425_v38 = vrot.slane %v424_v32, 2  ;;  %v344_v57 = vmax.f32 %v342_v39, %v343_v46  ;;  %v334_v58 = vmax.f32 %v1115_v33, %v333_v35  ;;  %v450_v60 = vadd.f32 %v449_v42, %v448_v27  ;;  %v1139_v27 = vpop.xlane.xlu1 %268 }
 0x13b   :  { %791 = vpow2.f32 %v397_v40  ;;  %v545_v52 = vmul.f32 %v529_v30, %v956_v4  ;;  %v498_v25 = vadd.f32 %v497_v43, %v496_v29  ;;  %v291_v2 = vrot.slane %v1126_v55, 4 }
 0x13c   :  { %v1120_v41 = vpop.eup %785  ;;  %v426_v45 = vadd.f32 %v425_v38, %v424_v32  ;;  %793 = vrcp.f32 %v470_v31  ;;  %v380_v4 = vsub.f32 %v1096_v44, %v344_v57  ;;  %v335_v22 = vrot.slane %v334_v58, 2 }
 0x13d   :  { %v1122_v47 = vpop.eup %787  ;;  %v471_v48 = vrot.slane %v1120_v41, 4  ;;  %795 = vrcp.f32 %v494_v20  ;;  %v561_v19 = vsel %vm74_vm0, %v545_v52, 0.0  ;;  %v451_v23 = vrot.slane %v450_v60, 1 }
 0x13e   :  { %v427_v59 = vrot.slane %v426_v45, 1  ;;  %v429_v49 = vrot.slane %v1122_v47, 4  ;;  %v790_v51 = vpop.eup %789  ;;  %v499_v54 = vrot.slane %v498_v25, 1  ;;  %v407_v26 = vmul.f32 1.442695, %v380_v4 }
 0x13f   :  { %v472_v56 = vadd.f32 %v1120_v41, %v471_v48  ;;  %v533_v3 = vmul.f32 %v790_v51, %v1069_v50  ;;  %v336_v50 = vmax.f32 %v334_v58, %v335_v22  ;;  %v292_v34 = vmax.f32 %v1126_v55, %v291_v2  ;;  %v1148_v51 = vpop.xlane.xlu2 %247 }
 0x140   :  { %v428_v62 = vadd.f32 %v427_v59, %v426_v45  ;;  %v430_v1 = vadd.f32 %v1122_v47, %v429_v49  ;;  %v562_v37 = vrot.slane %v561_v19, 4  ;;  %v357_v35 = vrot.slane %v1139_v27, 4 }
 0x141   :  { %v473_v63 = vrot.slane %v472_v56, 2  ;;  %v1135_v17 = vpop.eup %791  ;;  %v337_v40 = vrot.slane %v336_v50, 1  ;;  %v1145_v43 = vmul.f32 %v533_v3, %v958_v5  ;;  %v452_v45 = vadd.f32 %v451_v23, %v450_v60  ;;  %v1150_v52 = vpop.xlane.xlu0 %271 }
 0x142   :  { %797 = vrcp.f32 %v428_v62  ;;  %v431_v21 = vrot.slane %v430_v1, 2  ;;  %v453_v24 = vrot.slane %v1135_v17, 4  ;;  %v794_v44 = vpop.eup %793  ;;  %v293_v20 = vrot.slane %v292_v34, 2 }
 0x143   :  { %v474_v53 = vadd.f32 %v473_v63, %v472_v56  ;;  %799 = vpow2.f32 %v407_v26  ;;  %v796_v39 = vpop.eup %795  ;;  %v537_v48 = vmul.f32 %v794_v44, %v1088_v28  ;;  %v500_v59 = vadd.f32 %v499_v54, %v498_v25 }
 0x144   :  { %v432_v32 = vadd.f32 %v431_v21, %v430_v1  ;;  %v454_v38 = vadd.f32 %v1135_v17, %v453_v24  ;;  %v1152_v56 = vadd.f32 %v562_v37, %v561_v19  ;;  %v1155_v57 = vmul.f32 %v796_v39, %v1091_v36 }
 0x145   :  { %v475_v29 = vrot.slane %v474_v53, 1  ;;  %v338_v5 = vmax.f32 %v336_v50, %v337_v40  ;;  %v294_v62 = vmax.f32 %v292_v34, %v293_v20  ;;  %v358_v28 = vmax.f32 %v1139_v27, %v357_v35 }
 0x146   :  { %v433_v31 = vrot.slane %v432_v32, 1  ;;  %v455_v46 = vrot.slane %v454_v38, 2  ;;  %v315_v2 = vrot.slane %v1148_v51, 4  ;;  %v363_v3 = vrot.slane %v1150_v52, 4 }
 0x147   :  { %v476_v30 = vadd.f32 %v475_v29, %v474_v53  ;;  %v379_v1 = vsub.f32 %v1115_v33, %v338_v5  ;;  %v295_v4 = vrot.slane %v294_v62, 1  ;;  %v359_v19 = vrot.slane %v358_v28, 2 }
 0x148   :  { %v798_v42 = vpop.eup %797  ;;  %v434_v49 = vadd.f32 %v433_v31, %v432_v32  ;;  %v456_v58 = vadd.f32 %v455_v46, %v454_v38  ;;  %v316_v21 = vmax.f32 %v1148_v51, %v315_v2  ;;  %v364_v24 = vmax.f32 %v1150_v52, %v363_v3 }
 0x149   :  { %801 = vrcp.f32 %v476_v30  ;;  %v530_v60 = vmul.f32 %v798_v42, %v1108_v15  ;;  %v1159_v25 = vpop.eup %799  ;;  %v553_v15 = vmul.f32 %v537_v48, %v960_v6  ;;  %v405_v53 = vmul.f32 1.442695, %v379_v1 }
 0x14a   :  { %803 = vrcp.f32 %v434_v49  ;;  %v457_v63 = vrot.slane %v456_v58, 1  ;;  %v483_v36 = vrot.slane %v1159_v25, 4  ;;  %v296_v54 = vmax.f32 %v294_v62, %v295_v4 }
 0x14b   :  { %805 = vrcp.f32 %v452_v45  ;;  %v360_v33 = vmax.f32 %v358_v28, %v359_v19  ;;  %v546_v26 = vmul.f32 %v530_v60, %v972_v8  ;;  %v317_v50 = vrot.slane %v316_v21, 2 }
 0x14c   :  { %807 = vrcp.f32 %v500_v59  ;;  %v484_v23 = vadd.f32 %v1159_v25, %v483_v36  ;;  %v458_v32 = vadd.f32 %v457_v63, %v456_v58  ;;  %v372_v6 = vsub.f32 %v1126_v55, %v296_v54 }
 0x14d   :  { %809 = vpow2.f32 %v405_v53  ;;  %v361_v37 = vrot.slane %v360_v33, 1  ;;  %v617_v38 = vsel %vm74_vm0, %v553_v15, 0.0  ;;  %v318_v31 = vmax.f32 %v316_v21, %v317_v50 }
 0x14e   :  { %v485_v44 = vrot.slane %v484_v23, 2  ;;  %v391_v8 = vmul.f32 1.442695, %v372_v6  ;;  %v568_v46 = vsel %vm74_vm0, %v546_v26, 0.0  ;;  %811 = vrcp.f32 %v458_v32 }
 0x14f   :  { %v802_v22 = vpop.eup %801  ;;  %v362_v42 = vmax.f32 %v360_v33, %v361_v37  ;;  %v319_v55 = vrot.slane %v318_v31, 1  ;;  %v618_v48 = vrot.slane %v617_v38, 4  ;;  %v569_v28 = vrot.slane %v568_v46, 4 }
 0x150   :  { %v538_v29 = vmul.f32 %v802_v22, %v1120_v41  ;;  %v804_v34 = vpop.eup %803  ;;  %v486_v35 = vadd.f32 %v485_v44, %v484_v23  ;;  %v365_v41 = vrot.slane %v364_v24, 2  ;;  %813 = vpow2.f32 %v391_v8 }
 0x151   :  { %v531_v30 = vmul.f32 %v804_v34, %v1122_v47  ;;  %v806_v40 = vpop.eup %805  ;;  %v564_v47 = vrot.slane %v1152_v56, 2  ;;  %v320_v58 = vmax.f32 %v318_v31, %v319_v55  ;;  %v619_v36 = vadd.f32 %v618_v48, %v617_v38 }
 0x152   :  { %v554_v39 = vmul.f32 %v538_v29, %v976_v10  ;;  %v808_v45 = vpop.eup %807  ;;  %v487_v59 = vrot.slane %v486_v35, 1  ;;  %v383_v10 = vsub.f32 %v1139_v27, %v362_v42  ;;  %v366_v5 = vmax.f32 %v364_v24, %v365_v41 }
 0x153   :  { %v547_v20 = vmul.f32 %v531_v30, %v988_v12  ;;  %v1180_v60 = vpop.eup %809  ;;  %v534_v62 = vmul.f32 %v806_v40, %v1101_v61  ;;  %v376_v3 = vsub.f32 %v1148_v51, %v320_v58  ;;  %v1188_v4 = vmul.f32 %v1155_v57, %v962_v7 }
 0x154   :  { %v624_v12 = vsel %vm74_vm0, %v554_v39, 0.0  ;;  %v488_v63 = vadd.f32 %v487_v59, %v486_v35  ;;  %v477_v1 = vrot.slane %v1180_v60, 4  ;;  %v413_v2 = vmul.f32 1.442695, %v383_v10  ;;  %v812_v15 = vpop.eup %811 }
 0x155   :  { %v575_v49 = vsel %vm74_vm0, %v547_v20, 0.0  ;;  %v367_v27 = vrot.slane %v366_v5, 1  ;;  %v399_v53 = vmul.f32 1.442695, %v376_v3  ;;  %v1194_v23 = vadd.f32 %v564_v47, %v1152_v56 }
 0x156   :  { %v576_v19 = vrot.slane %v575_v49, 4  ;;  %815 = vrcp.f32 %v488_v63  ;;  %v478_v61 = vadd.f32 %v1180_v60, %v477_v1  ;;  %v1191_v22 = vpop.eup %813  ;;  %v550_v51 = vmul.f32 %v534_v62, %v974_v9 }
 0x157   :  { %817 = vpow2.f32 %v413_v2  ;;  %v368_v21 = vmax.f32 %v366_v5, %v367_v27  ;;  %v570_v54 = vadd.f32 %v569_v28, %v568_v46  ;;  %v625_v33 = vrot.slane %v624_v12, 4 }
 0x158   :  { %v479_v24 = vrot.slane %v478_v61, 2  ;;  %v435_v7 = vrot.slane %v1191_v22, 4  ;;  %819 = vpow2.f32 %v399_v53  ;;  %v620_v26 = vrot.slane %v619_v36, 2 }
 0x159   :  { %v384_v57 = vsub.f32 %v1150_v52, %v368_v21  ;;  %v577_v29 = vadd.f32 %v576_v19, %v575_v49  ;;  %v535_v32 = vmul.f32 %v812_v15, %v1135_v17  ;;  %v589_v50 = vsel %vm74_vm0, %v1145_v43, 0.0 }
 0x15a   :  { %v542_v56 = vmul.f32 %v808_v45, %v1105_v0  ;;  %v480_v34 = vadd.f32 %v479_v24, %v478_v61  ;;  %v436_v9 = vadd.f32 %v1191_v22, %v435_v7  ;;  %v571_v37 = vrot.slane %v570_v54, 2 }
 0x15b   :  { %v415_v44 = vmul.f32 1.442695, %v384_v57  ;;  %v626_v38 = vadd.f32 %v625_v33, %v624_v12  ;;  %v590_v39 = vrot.slane %v589_v50, 4  ;;  %v596_v30 = vsel %vm74_vm0, %v550_v51, 0.0 }
 0x15c   :  { %v816_v6 = vpop.eup %815  ;;  %v481_v17 = vrot.slane %v480_v34, 1  ;;  %v437_v40 = vrot.slane %v436_v9, 2  ;;  %v1208_v43 = vadd.f32 %v620_v26, %v619_v36  ;;  %v578_v0 = vrot.slane %v577_v29, 2 }
 0x15d   :  { %v1205_v52 = vpop.eup %817  ;;  %v540_v31 = vmul.f32 %v816_v6, %v1159_v25  ;;  %821 = vpow2.f32 %v415_v44  ;;  %v551_v8 = vmul.f32 %v535_v32, %v990_v13  ;;  %v597_v20 = vrot.slane %v596_v30, 4 }
 0x15e   :  { %v501_v35 = vrot.slane %v1205_v52, 4  ;;  %v1212_v42 = vpop.eup %819  ;;  %v482_v45 = vadd.f32 %v481_v17, %v480_v34  ;;  %v438_v46 = vadd.f32 %v437_v40, %v436_v9  ;;  %v1215_v55 = vadd.f32 %v571_v37, %v570_v54 }
 0x15f   :  { %v556_v41 = vmul.f32 %v540_v31, %v1003_v18  ;;  %v627_v25 = vrot.slane %v626_v38, 2  ;;  %v459_v59 = vrot.slane %v1212_v42, 4  ;;  %v591_v49 = vadd.f32 %v590_v39, %v589_v50 }
 0x160   :  { %v502_v48 = vadd.f32 %v1205_v52, %v501_v35  ;;  %823 = vrcp.f32 %v482_v45  ;;  %v439_v47 = vrot.slane %v438_v46, 1  ;;  %v603_v18 = vsel %vm74_vm0, %v551_v8, 0.0 }
 0x161   :  { %v638_v10 = vsel %vm74_vm0, %v556_v41, 0.0  ;;  %v460_v5 = vadd.f32 %v1212_v42, %v459_v59  ;;  %v566_v12 = vrot.slane %v1194_v23, 1  ;;  %v579_v63 = vadd.f32 %v578_v0, %v577_v29 }
 0x162   :  { %v639_v13 = vrot.slane %v638_v10, 4  ;;  %v503_v58 = vrot.slane %v502_v48, 2  ;;  %v440_v28 = vadd.f32 %v439_v47, %v438_v46  ;;  %v598_v1 = vadd.f32 %v597_v20, %v596_v30 }
 0x163   :  { %v1222_v62 = vpop.eup %821  ;;  %v558_v2 = vmul.f32 %v542_v56, %v978_v11  ;;  %v461_v27 = vrot.slane %v460_v5, 2  ;;  %v592_v15 = vrot.slane %v591_v49, 2  ;;  %v604_v61 = vrot.slane %v603_v18, 4 }
 0x164   :  { %v504_v3 = vadd.f32 %v503_v58, %v502_v48  ;;  %v507_v36 = vrot.slane %v1222_v62, 4  ;;  %v640_v19 = vadd.f32 %v639_v13, %v638_v10  ;;  %825 = vrcp.f32 %v440_v28 }
 0x165   :  { %v628_v53 = vadd.f32 %v627_v25, %v626_v38  ;;  %v462_v51 = vadd.f32 %v461_v27, %v460_v5  ;;  %v1229_v24 = vadd.f32 %v566_v12, %v1194_v23  ;;  %v573_v7 = vrot.slane %v1215_v55, 1 }
 0x166   :  { %v505_v21 = vrot.slane %v504_v3, 1  ;;  %v508_v54 = vadd.f32 %v1222_v62, %v507_v36  ;;  %v824_v33 = vpop.eup %823  ;;  %v580_v11 = vrot.slane %v579_v63, 1  ;;  %v599_v57 = vrot.slane %v598_v1, 2 }
 0x167   :  { %v539_v26 = vmul.f32 %v824_v33, %v1180_v60  ;;  %v463_v32 = vrot.slane %v462_v51, 1  ;;  %v593_v56 = vadd.f32 %v592_v15, %v591_v49  ;;  %v605_v34 = vadd.f32 %v604_v61, %v603_v18 }
 0x168   :  { %v506_v29 = vadd.f32 %v505_v21, %v504_v3  ;;  %v509_v50 = vrot.slane %v508_v54, 2  ;;  %v641_v9 = vrot.slane %v640_v19, 2  ;;  %v645_v44 = vsel %vm74_vm0, %v1188_v4, 0.0 }
 0x169   :  { %v555_v6 = vmul.f32 %v539_v26, %v992_v14  ;;  %v464_v23 = vadd.f32 %v463_v32, %v462_v51  ;;  %v600_v39 = vadd.f32 %v599_v57, %v598_v1  ;;  %v622_v30 = vrot.slane %v1208_v43, 1  ;;  %v834_v51 = vld [vmem:[#allocation2 + $0x38] sm:$0xff] }
 0x16a   :  { %827 = vrcp.f32 %v506_v29  ;;  %v510_v37 = vadd.f32 %v509_v50, %v508_v54  ;;  %v826_v38 = vpop.eup %825  ;;  %v646_v31 = vrot.slane %v645_v44, 4  ;;  %v652_v60 = vsel %vm74_vm0, %v558_v2, 0.0 }
 0x16b   :  { %v631_v17 = vsel %vm74_vm0, %v555_v6, 0.0  ;;  %v532_v40 = vmul.f32 %v826_v38, %v1191_v22  ;;  %829 = vrcp.f32 %v464_v23  ;;  %v594_v4 = vrot.slane %v593_v56, 1 }
 0x16c   :  { %v511_v0 = vrot.slane %v510_v37, 1  ;;  %v632_v35 = vrot.slane %v631_v17, 4  ;;  %v606_v8 = vrot.slane %v605_v34, 2  ;;  %v653_v14 = vrot.slane %v652_v60, 4 }
 0x16d   :  { %v548_v41 = vmul.f32 %v532_v40, %v1001_v16  ;;  %v642_v46 = vadd.f32 %v641_v9, %v640_v19  ;;  %v647_v20 = vadd.f32 %v646_v31, %v645_v44  ;;  %v574_v48 = vadd.f32 %v573_v7, %v1215_v55  ;;  %v835_v44 = vld [vmem:[#allocation2 + $0x78] sm:$0xff] }
 0x16e   :  { %v512_v45 = vadd.f32 %v511_v0, %v510_v37  ;;  %v633_v25 = vadd.f32 %v632_v35, %v631_v17  ;;  %v581_v59 = vadd.f32 %v580_v11, %v579_v63  ;;  %v601_v10 = vrot.slane %v600_v39, 1  ;;  %v833_v63 = vld [vmem:[#allocation2 + $0x70] sm:$0xff] }
 0x16f   :  { %v582_v49 = vsel %vm74_vm0, %v548_v41, 0.0  ;;  %v629_v22 = vrot.slane %v628_v53, 1  ;;  %v654_v13 = vadd.f32 %v653_v14, %v652_v60  ;;  %v623_v16 = vadd.f32 %v622_v30, %v1208_v43 }
 0x170   :  { %v828_v47 = vpop.eup %827  ;;  %831 = vrcp.f32 %v512_v45  ;;  %v634_v58 = vrot.slane %v633_v25, 2  ;;  %v583_v5 = vrot.slane %v582_v49, 4  ;;  %v595_v12 = vadd.f32 %v594_v4, %v593_v56 }
 0x171   :  { %v543_v18 = vmul.f32 %v828_v47, %v1205_v52  ;;  %v830_v28 = vpop.eup %829  ;;  %v607_v1 = vadd.f32 %v606_v8, %v605_v34  ;;  %v643_v2 = vrot.slane %v642_v46, 1  ;;  %v648_v3 = vrot.slane %v647_v20, 2 }
 0x172   :  { %v584_v55 = vadd.f32 %v583_v5, %v582_v49  ;;  %v536_v36 = vmul.f32 %v830_v28, %v1212_v42  ;;  %v635_v19 = vadd.f32 %v634_v58, %v633_v25  ;;  %v602_v15 = vadd.f32 %v601_v10, %v600_v39 }
 0x173   :  { %v559_v27 = vmul.f32 %v833_v63, %v543_v18  ;;  %v630_v61 = vadd.f32 %v629_v22, %v628_v53  ;;  %v655_v21 = vrot.slane %v654_v13, 2  ;;  %v608_v11 = vrot.slane %v607_v1, 1 }
 0x174   :  { %v552_v54 = vmul.f32 %v834_v51, %v536_v36  ;;  %v585_v52 = vrot.slane %v584_v55, 2  ;;  %v636_v33 = vrot.slane %v635_v19, 1  ;;  %v644_v57 = vadd.f32 %v643_v2, %v642_v46 }
 0x175   :  { %v659_v43 = vsel %vm74_vm0, %v559_v27, 0.0  ;;  %v649_v26 = vadd.f32 %v648_v3, %v647_v20  ;;  %v690_v9 = vsel %vm689_vm2, %v574_v48, %v1229_v24  ;;  %v656_v37 = vadd.f32 %v655_v21, %v654_v13 }
 0x176   :  { %v832_v7 = vpop.eup %831  ;;  %v660_v29 = vrot.slane %v659_v43, 4  ;;  %v586_v50 = vadd.f32 %v585_v52, %v584_v55  ;;  %v610_v42 = vsel %vm74_vm0, %v552_v54, 0.0  ;;  %v637_v56 = vadd.f32 %v636_v33, %v635_v19 }
 0x177   :  { %v544_v32 = vmul.f32 %v832_v7, %v1222_v62  ;;  %v611_v53 = vrot.slane %v610_v42, 4  ;;  %v703_v38 = vsel %vm689_vm2, %v630_v61, %v623_v16  ;;  %v650_v60 = vrot.slane %v649_v26, 1 }
 0x178   :  { %v661_v34 = vadd.f32 %v660_v29, %v659_v43  ;;  %v587_v23 = vrot.slane %v586_v50, 1  ;;  %v704_v62 = vsel %vm691_vm3, %v637_v56, %v703_v38  ;;  %v692_v35 = vsel %vm691_vm3, %v581_v59, %v690_v9 }
 0x179   :  { %v560_v6 = vmul.f32 %v835_v44, %v544_v32  ;;  %v612_v39 = vadd.f32 %v611_v53, %v610_v42  ;;  %v657_v4 = vrot.slane %v656_v37, 1  ;;  %v705_v14 = vsel %vm693_vm4, %v644_v57, %v704_v62 }
 0x17a   :  { %v662_v30 = vrot.slane %v661_v34, 2  ;;  %v588_v31 = vadd.f32 %v587_v23, %v586_v50  ;;  %v651_v25 = vadd.f32 %v650_v60, %v649_v26  ;;  %v609_v49 = vadd.f32 %v608_v11, %v607_v1 }
 0x17b   :  { %v666_v17 = vsel %vm74_vm0, %v560_v6, 0.0  ;;  %v613_v40 = vrot.slane %v612_v39, 2  ;;  %v658_v58 = vadd.f32 %v657_v4, %v656_v37 }
 0x17c   :  { %v663_v0 = vadd.f32 %v662_v30, %v661_v34  ;;  %v667_v24 = vrot.slane %v666_v17, 4  ;;  %v694_v8 = vsel %vm693_vm4, %v588_v31, %v692_v35  ;;  %v706_v59 = vsel %vm695_vm5, %v651_v25, %v705_v14 }
 0x17d   :  { %v614_v41 = vadd.f32 %v613_v40, %v612_v39  ;;  %v696_v20 = vsel %vm695_vm5, %v595_v12, %v694_v8  ;;  %v707_v12 = vsel %vm697_vm6, %v658_v58, %v706_v59 }
 0x17e   :  { %v664_v45 = vrot.slane %v663_v0, 1  ;;  %v668_v46 = vadd.f32 %v667_v24, %v666_v17  ;;  %v698_v47 = vsel %vm697_vm6, %v602_v15, %v696_v20 }
 0x17f   :  { %v615_v48 = vrot.slane %v614_v41, 1  ;;  %v700_v18 = vsel %vm699_vm7, %v609_v49, %v698_v47 }
 0x180   :  { %v669_v10 = vrot.slane %v668_v46, 2  ;;  %v665_v22 = vadd.f32 %v664_v45, %v663_v0 }
 0x181   :  { %v616_v13 = vadd.f32 %v615_v48, %v614_v41 }
 0x182   :  { %v670_v5 = vadd.f32 %v669_v10, %v668_v46  ;;  %v708_v1 = vsel %vm699_vm7, %v665_v22, %v707_v12 }
 0x183   :  { %v702_v28 = vsel %vm701_vm8, %v616_v13, %v700_v18 }
 0x184   :  { %v671_v16 = vrot.slane %v670_v5, 1  ;;  %712 = vst.msk [vmem:[#allocation7] sm:$0xff] %vm74_vm0, %v702_v28 }
 0x186   :  { %v672_v2 = vadd.f32 %v671_v16, %v670_v5 }
 0x188   :  { %v709_v3 = vsel %vm701_vm8, %v672_v2, %v708_v1 }
 0x189   :  { %713 = vst.msk [vmem:[#allocation7 + $0x8] sm:$0xff] %vm74_vm0, %v709_v3 }
 0x18a   :  { %726 = dma.vmem_to_hbm [thread:$0]  %s719_s3, 256, %s721_s5, [#allocation4], %s915_s23, %s915_s23, %s916_s24  }
 0x18b   :  { %912 = dma.done.wait [#allocation4], 256  }
 0x18c   :  { %913 = vsyncadd [#allocation4], 4294967040 }
 0x18d   :  { %731 = vsyncpa [#allocation3], 1 }
 0x18e   :  { %732 = vsyncpa [#allocation6], 1 }
 0x18f   :  { %733 = vsyncpa [#allocation4], 1 }

</bundles_post_ra>
